<compile_context>
chip_gen: v5e
topology: v5e:2x2
jax: 0.10.0
libtpu: 0.0.40
codegen_flags: <defaults>
</compile_context>

<pallas_src>
import math
import functools

import jax
import jax.numpy as jnp
from jax.experimental import pallas as pl
from jax.experimental.pallas import tpu as pltpu

_VMEM_LIMIT_BYTES = 32 * 1024 * 1024
_TARGET_BLOCK_BYTES = 2 * 1024 * 1024


def make_positional_encoding_table(d_model, max_len=5000, dtype=jnp.float32):
    """Builds the sin/cos table exactly like the PyTorch __init__."""
    if d_model % 2 != 0:
        # Same limitation as the PyTorch original (odd d_model shape-mismatches).
        raise ValueError(f"d_model must be even, got {d_model}")
    position = jnp.arange(0, max_len, dtype=jnp.float32)[:, None]          # [max_len, 1]
    div_term = jnp.exp(
        jnp.arange(0, d_model, 2, dtype=jnp.float32) * (-math.log(10000.0) / d_model)
    )                                                                       # [d_model/2]
    angles = position * div_term                                            # [max_len, d_model/2]
    pe = jnp.zeros((max_len, d_model), dtype=jnp.float32)
    pe = pe.at[:, 0::2].set(jnp.sin(angles))
    pe = pe.at[:, 1::2].set(jnp.cos(angles))
    return pe.astype(dtype)                                                 # [max_len, d_model]


def _pe_add_3d_kernel(x_ref, pe_ref, o_ref):
    # Batch dim is squeezed by the BlockSpec: all refs are (tS, D). No broadcast.
    o_ref[...] = x_ref[...] + pe_ref[...]


def _pe_add_2d_kernel(x_ref, pe_ref, o_ref):
    # x_ref/o_ref: (B, tF) lane-dense flattened block; pe_ref: (1, tF).
    # Sublane broadcast of pe across the batch rows.
    o_ref[...] = x_ref[...] + pe_ref[...]


def _round_down(x, m):
    return (x // m) * m


def _pick_seq_tile(S, D, itemsize, target_bytes=_TARGET_BLOCK_BYTES):
    rows = max(8, _round_down(max(8, target_bytes // (D * itemsize)), 8))
    if S <= rows:
        return S          # full-dim block: always legal
    return rows           # multiple of 8


def _pick_flat_tile(flat, B, itemsize, target_bytes=_TARGET_BLOCK_BYTES):
    lanes = max(128, _round_down(max(128, target_bytes // (B * itemsize)), 128))
    if flat <= lanes:
        return flat       # full-dim block: always legal
    return lanes          # multiple of 128


@jax.jit
def positional_encoding_forward(x, pe):
    """x: [B, S, D]; pe: [max_len, D]. Returns x + pe[:S] (dropout = identity, eval mode)."""
    B, S, D = x.shape
    max_len = pe.shape[0]
    if S > max_len:
        raise ValueError(f"sequence length {S} exceeds max_len {max_len}")
    pe = pe.astype(x.dtype)
    itemsize = jnp.dtype(x.dtype).itemsize

    if D % 128 == 0:
        # Lane-dense already: tile the sequence axis, keep pe tile resident
        # across the (innermost) batch axis, pass the full pe table.
        tS = _pick_seq_tile(S, D, itemsize)
        grid = (pl.cdiv(S, tS), B)
        return pl.pallas_call(
            _pe_add_3d_kernel,
            out_shape=jax.ShapeDtypeStruct((B, S, D), x.dtype),
            grid=grid,
            in_specs=[
                pl.BlockSpec((pl.Squeezed(), tS, D), lambda s, b: (b, s, 0)),
                pl.BlockSpec((tS, D), lambda s, b: (s, 0)),   # constant over inner b loop
            ],
            out_specs=pl.BlockSpec((pl.Squeezed(), tS, D), lambda s, b: (b, s, 0)),
            compiler_params=pltpu.CompilerParams(
                dimension_semantics=("parallel", "parallel"),
                vmem_limit_bytes=_VMEM_LIMIT_BYTES,
            ),
        )(x, pe)

    # D not a multiple of 128 (e.g. 32): flatten to a lane-dense [B, S*D]
    # layout so stores are unmasked full-width vst, and tile the flat axis.
    flat = S * D
    x2 = x.reshape(B, flat)
    pe2 = pe[:S].reshape(1, flat)       # static slice; tiny vs. the B*S*D stream
    tF = _pick_flat_tile(flat, B, itemsize)
    grid = (pl.cdiv(flat, tF),)
    out2 = pl.pallas_call(
        _pe_add_2d_kernel,
        out_shape=jax.ShapeDtypeStruct((B, flat), x.dtype),
        grid=grid,
        in_specs=[
            pl.BlockSpec((B, tF), lambda f: (0, f)),
            pl.BlockSpec((1, tF), lambda f: (0, f)),   # each pe tile fetched exactly once
        ],
        out_specs=pl.BlockSpec((B, tF), lambda f: (0, f)),
        compiler_params=pltpu.CompilerParams(
            dimension_semantics=("parallel",),
            vmem_limit_bytes=_VMEM_LIMIT_BYTES,
        ),
    )(x2, pe2)
    return out2.reshape(B, S, D)


if __name__ == "__main__":
    key = jax.random.PRNGKey(0)

    # --- Case 1: small d_model (< 128) -> lane-dense flattened path ---
    B, S, D = 2, 8, 32
    max_len = 64  # smaller than 5000 for the test; semantics identical for S <= max_len
    x = jax.random.normal(key, (B, S, D), dtype=jnp.float32)
    pe = make_positional_encoding_table(D, max_len=max_len, dtype=jnp.float32)
    out = jax.block_until_ready(positional_encoding_forward(x, pe))
    ref = x + pe[None, :S, :]
    assert jnp.allclose(out, ref, atol=1e-6), "mismatch vs reference (flattened path)"

    # --- Case 2: d_model multiple of 128 -> tiled-sequence path ---
    B2, S2, D2 = 2, 16, 128
    max_len2 = 32
    key2 = jax.random.fold_in(key, 1)
    x2 = jax.random.normal(key2, (B2, S2, D2), dtype=jnp.float32)
    pe2 = make_positional_encoding_table(D2, max_len=max_len2, dtype=jnp.float32)
    out2 = jax.block_until_ready(positional_encoding_forward(x2, pe2))
    ref2 = x2 + pe2[None, :S2, :]
    assert jnp.allclose(out2, ref2, atol=1e-6), "mismatch vs reference (3D tiled path)"

    print("KERNEL_OK")
</pallas_src>

<mosaic_0001>
module attributes {stable_mosaic.version = 11 : i64} {
  func.func @_pe_add_2d_kernel(%arg0: i32, %arg1: memref<2x256xf32, #tpu.memory_space<vmem>>, %arg2: memref<1x256xf32, #tpu.memory_space<vmem>>, %arg3: memref<2x256xf32, #tpu.memory_space<vmem>>) attributes {dimension_semantics = [#tpu.dimension_semantics<parallel>], iteration_bounds = array<i64: 1>, scalar_prefetch = 0 : i64, scratch_operands = 0 : i64, tpu.core_type = #tpu.core_type<tc>, window_params = [{transform_indices = @transform_0, window_bounds = array<i64: 2, 256>}, {transform_indices = @transform_1, window_bounds = array<i64: 1, 256>}, {transform_indices = @transform_2, window_bounds = array<i64: 2, 256>}]} {
    %c0 = arith.constant 0 : index
    %c0_0 = arith.constant 0 : index
    %0 = vector.load %arg1[%c0, %c0_0] : memref<2x256xf32, #tpu.memory_space<vmem>>, vector<2x256xf32>
    %c0_1 = arith.constant 0 : index
    %c0_2 = arith.constant 0 : index
    %1 = vector.load %arg2[%c0_1, %c0_2] : memref<1x256xf32, #tpu.memory_space<vmem>>, vector<1x256xf32>
    %2 = vector.broadcast %1 : vector<1x256xf32> to vector<2x256xf32>
    %3 = arith.addf %0, %2 : vector<2x256xf32>
    %c0_3 = arith.constant 0 : index
    %c0_4 = arith.constant 0 : index
    %4 = vector.load %arg3[%c0_3, %c0_4] : memref<2x256xf32, #tpu.memory_space<vmem>>, vector<2x256xf32>
    tpu.vector_store %arg3[%c0_3, %c0_4], %3 {strides = array<i32>} : memref<2x256xf32, #tpu.memory_space<vmem>>, vector<2x256xf32>,
    return
  }
  func.func @transform_0(%arg0: i32) -> (i32, i32) {
    %c0_i32 = arith.constant 0 : i32
    %c0_i32_0 = arith.constant 0 : i32
    return %c0_i32, %arg0 : i32, i32
  }
  func.func @transform_1(%arg0: i32) -> (i32, i32) {
    %c0_i32 = arith.constant 0 : i32
    %c0_i32_0 = arith.constant 0 : i32
    return %c0_i32, %arg0 : i32, i32
  }
  func.func @transform_2(%arg0: i32) -> (i32, i32) {
    %c0_i32 = arith.constant 0 : i32
    %c0_i32_0 = arith.constant 0 : i32
    return %c0_i32, %arg0 : i32, i32
  }
}

</mosaic_0001>

<bundles_post_ra>
// kernel: positional_encoding_forward.1
= control target key start
LH: loop header
LB: loop body
LE: loop exit
PB: predicated region body
PF: predicated region fallthrough
CT: control target
= control target key end

     0   :  { %vm17_vm0 = vcmask 1041408   ;;  %s50_s1 = inlined_call_operand.vmem [shape: f32[1,256], index: 1, kind: input, shape index: {}]   ;;  %s51_s0 = inlined_call_operand.vmem [shape: f32[2,256], index: 0, kind: input, shape index: {}]   ;;  %s52_s2 = inlined_call_operand.vmem [shape: f32[2,256], index: 2, kind: output, shape index: {}]  }
   0x1   :  { %v12_v0 = vld [vmem:[%s50_s1] sm:$0x3] }
   0x2   :  { %v14_v1 = vperm.slane %v12_v0, 0  ;;  %v15_v2 = vperm.slane %v12_v0, 1  ;;  %v11_v3 = vld [vmem:[%s51_s0] sm:$0xf] }
   0x4   :  { %v16_v4 = vrot.slane %v15_v2, 6 }
   0x6   :  { %v18_v5 = vsel %vm17_vm0, %v14_v1, %v16_v4 }
   0x7   :  { %v20_v6 = vadd.f32 %v18_v5, %v11_v3 }
   0x9   :  { %21 = vst [vmem:[%s52_s2] sm:$0xf] %v20_v6 }

</bundles_post_ra>
